<compile_context>
chip_gen: v7x
topology: tpu7x:2x2x1
jax: 0.10.0
libtpu: 0.0.40
codegen_flags: <defaults>
</compile_context>

<pallas_src>
import functools

import jax
import jax.numpy as jnp
from jax.experimental import pallas as pl
from jax.experimental.pallas import tpu as pltpu

_MIB = 1024 * 1024


def _head_kernel(hs_ref, w1_ref, b1_ref, w2_ref, b2_ref, out_ref, acc_ref,
                 *, seq_len, t_tile):
    """Grid step t: MXU-accumulate the T-tile sum; finalize the MLP head on the last step."""
    t = pl.program_id(0)
    n_t = pl.num_programs(0)
    batch = acc_ref.shape[0]
    d_model = acc_ref.shape[-1]

    @pl.when(t == 0)
    def _init():
        acc_ref[...] = jnp.zeros_like(acc_ref)

    def _accumulate(tile):
        # Sequence reduction on the MXU: ones(B,1,tT) @ tile(B,tT,D) -> (B,1,D),
        # accumulated natively in f32.  Products are 1.0 * x (exact), so this is
        # numerically the f32 sum of the bf16 inputs.
        ones = jnp.ones((batch, 1, t_tile), dtype=tile.dtype)
        acc_ref[...] += jnp.einsum('bqt,btd->bqd', ones, tile,
                                   preferred_element_type=jnp.float32)

    rem = seq_len % t_tile
    if rem == 0:
        # Steady state (also the only state): pure load -> matmul-accumulate.
        _accumulate(hs_ref[...])
    else:
        # Only the final tile is partial; keep any masking off the steady-state path.
        @pl.when(t < n_t - 1)
        def _steady():
            _accumulate(hs_ref[...])

        @pl.when(t == n_t - 1)
        def _tail():
            # Select-based zeroing of padded rows so garbage/NaN past T never
            # enters the accumulate (0 * NaN would propagate; where() does not).
            row = jax.lax.broadcasted_iota(jnp.int32, (1, t_tile, 1), 1)
            tile = jnp.where(row < rem, hs_ref[...], 0.0)
            _accumulate(tile)

    @pl.when(t == n_t - 1)
    def _finalize():
        # mean(dim=1): scale the f32 running sum once.
        pooled = acc_ref[...].reshape(batch, d_model) * jnp.float32(1.0 / seq_len)

        # classifier[0]: Linear(d_model, 256); classifier[1]: ReLU
        h = jnp.dot(pooled.astype(w1_ref.dtype), w1_ref[...],
                    preferred_element_type=jnp.float32)
        h = jnp.maximum(h + b1_ref[...].astype(jnp.float32), 0.0)

        # classifier[2]: Dropout(0.2) -- identity in eval mode.

        # classifier[3]: Linear(256, num_labels)
        logits = jnp.dot(h.astype(w2_ref.dtype), w2_ref[...],
                         preferred_element_type=jnp.float32)
        out_ref[...] = (logits + b2_ref[...].astype(jnp.float32)).astype(out_ref.dtype)


def _vmem_plan(vmem_limit_bytes, tile_budget_bytes):
    """Per-generation VMEM limit / per-buffer hidden-state tile budget."""
    phys = 64 * _MIB  # conservative fallback (v7x per-core VMEM)
    try:
        info = pltpu.get_tpu_info()
        phys = int(getattr(info, "vmem_capacity_bytes", phys))
    except Exception:
        pass
    if vmem_limit_bytes is None:
        # ~96 MiB on 128 MiB chips (v5e/v6e), ~48 MiB on 64 MiB chips (v7x).
        vmem_limit_bytes = min(phys * 3 // 4, 96 * _MIB)
    if tile_budget_bytes is None:
        # Double-buffered hidden-state slab + weights + accumulator must fit the
        # scoped limit: ~32 MiB/buffer on v5e/v6e, ~16 MiB/buffer on v7x.
        tile_budget_bytes = min(max((vmem_limit_bytes - 16 * _MIB) // 2, 4 * _MIB),
                                32 * _MIB)
    return vmem_limit_bytes, tile_budget_bytes


def whisper_classifier_head(hidden_states, w1, b1, w2, b2, *,
                            t_tile=None,
                            tile_budget_bytes=None,
                            vmem_limit_bytes=None,
                            cast_activations_to_bf16=True):
    """Fused mean-pool(T) + Linear/ReLU/Linear head.

    hidden_states: [B, T, D] (bf16 preferred), w1: [D, H], b1: [1, H],
    w2: [H, L], b2: [1, L].  Returns f32 logits [B, L].
    """
    B, T, D = hidden_states.shape
    H = w1.shape[1]
    L = w2.shape[1]

    # The pooling is HBM-bandwidth bound: stream activations as bf16.
    if cast_activations_to_bf16 and hidden_states.dtype == jnp.float32:
        hidden_states = hidden_states.astype(jnp.bfloat16)

    vmem_limit_bytes, tile_budget_bytes = _vmem_plan(vmem_limit_bytes,
                                                     tile_budget_bytes)

    itemsize = jnp.dtype(hidden_states.dtype).itemsize
    sublane = 8 * (4 // itemsize)        # 8 rows for f32, 16 for bf16

    if t_tile is None:
        # Largest sublane-aligned tile whose (double-buffered) hidden-state slab
        # stays inside the per-buffer budget derived from this chip's VMEM.
        tT = tile_budget_bytes // max(1, B * D * itemsize)
        tT = max(sublane, (tT // sublane) * sublane)
        t_tile = min(T, tT)
    t_tile = min(t_tile, T)
    if t_tile < T:
        assert t_tile % sublane == 0, (
            f"t_tile={t_tile} must be a multiple of {sublane} for dtype "
            f"{hidden_states.dtype} (or equal the full sequence length {T})")

    n_t = pl.cdiv(T, t_tile)

    kernel = functools.partial(_head_kernel, seq_len=T, t_tile=t_tile)

    w1_bytes = (D * H + H) * jnp.dtype(w1.dtype).itemsize
    w2_bytes = (H * L + L) * jnp.dtype(w2.dtype).itemsize
    cost = pl.CostEstimate(
        flops=2 * B * T * D + 2 * B * D * H + 2 * B * H * L,
        transcendentals=0,
        bytes_accessed=B * T * D * itemsize + w1_bytes + w2_bytes + B * L * 4,
    )

    grid_spec = pltpu.PrefetchScalarGridSpec(
        num_scalar_prefetch=0,
        grid=(n_t,),
        in_specs=[
            # Hidden-state tile marches along T; B and D stay whole.
            pl.BlockSpec((B, t_tile, D), lambda t: (0, t, 0)),
            # Weights/biases: same block every step -> stay VMEM-resident.
            pl.BlockSpec((D, H), lambda t: (0, 0)),
            pl.BlockSpec((1, H), lambda t: (0, 0)),
            pl.BlockSpec((H, L), lambda t: (0, 0)),
            pl.BlockSpec((1, L), lambda t: (0, 0)),
        ],
        out_specs=pl.BlockSpec((B, L), lambda t: (0, 0)),
        scratch_shapes=[pltpu.VMEM((B, 1, D), jnp.float32)],  # pooled-sum accumulator
    )

    return pl.pallas_call(
        kernel,
        out_shape=jax.ShapeDtypeStruct((B, L), jnp.float32),
        grid_spec=grid_spec,
        compiler_params=pltpu.CompilerParams(
            dimension_semantics=("arbitrary",),   # T is a carried reduction axis
            vmem_limit_bytes=vmem_limit_bytes,
        ),
        cost_estimate=cost,
    )(hidden_states, w1, b1, w2, b2)


def init_linear(key, fan_in, fan_out):
    """Deterministic nn.Linear-style init: U(-1/sqrt(fan_in), 1/sqrt(fan_in))."""
    kw, kb = jax.random.split(key)
    bound = 1.0 / jnp.sqrt(fan_in)
    w = jax.random.uniform(kw, (fan_in, fan_out), jnp.float32, -bound, bound)
    b = jax.random.uniform(kb, (1, fan_out), jnp.float32, -bound, bound)
    return w, b


if __name__ == "__main__":
    # Small shapes consistent with the forward pass:
    #   B = batch, T = encoder sequence length, D = whisper d_model stand-in,
    #   HIDDEN = 256 (fixed in the module), NUM_LABELS = classifier output size.
    # T=40 with t_tile=16 exercises the multi-step accumulate path AND the
    # pl.when-gated partial last tile (rem = 8).
    B, T, D = 2, 40, 64
    HIDDEN = 256
    NUM_LABELS = 6

    key = jax.random.PRNGKey(0)
    k_hs, k_l1, k_l2 = jax.random.split(key, 3)

    # Stand-in for whisper.encoder(processor(input_values)).last_hidden_state,
    # delivered in bf16 (halves the HBM traffic of the bandwidth-bound pooling).
    hidden_states = jax.random.normal(k_hs, (B, T, D), jnp.float32).astype(jnp.bfloat16)

    w1, b1 = init_linear(k_l1, D, HIDDEN)            # nn.Linear(d_model, 256)
    w2, b2 = init_linear(k_l2, HIDDEN, NUM_LABELS)   # nn.Linear(256, num_labels)

    logits = whisper_classifier_head(hidden_states, w1, b1, w2, b2, t_tile=16)
    jax.block_until_ready(logits)

    # Reference check against plain JAX (eval-mode forward), f32 accumulation.
    hs_f32 = hidden_states.astype(jnp.float32)
    pooled_ref = hs_f32.mean(axis=1)
    ref = jnp.maximum(pooled_ref @ w1 + b1, 0.0) @ w2 + b2

    assert logits.shape == (B, NUM_LABELS)
    assert jnp.allclose(logits, ref, atol=1e-4, rtol=1e-4), (
        f"max abs err = {jnp.max(jnp.abs(logits - ref))}")

    print("KERNEL_OK")
</pallas_src>

<mosaic_0001>
module attributes {stable_mosaic.version = 11 : i64} {
  func.func @_head_kernel(%arg0: i32, %arg1: memref<2x16x64xbf16, #tpu.memory_space<vmem>>, %arg2: memref<64x256xf32, #tpu.memory_space<vmem>>, %arg3: memref<1x256xf32, #tpu.memory_space<vmem>>, %arg4: memref<256x6xf32, #tpu.memory_space<vmem>>, %arg5: memref<1x6xf32, #tpu.memory_space<vmem>>, %arg6: memref<2x6xf32, #tpu.memory_space<vmem>>, %arg7: memref<2x1x64xf32, #tpu.memory_space<vmem>>) attributes {dimension_semantics = [#tpu.dimension_semantics<arbitrary>], iteration_bounds = array<i64: 3>, scalar_prefetch = 0 : i64, scratch_operands = 1 : i64, tpu.core_type = #tpu.core_type<tc>, window_params = [{transform_indices = @transform_0, window_bounds = array<i64: 2, 16, 64>}, {pipeline_mode = #tpu.pipeline_mode<synchronous>, transform_indices = @transform_1, window_bounds = array<i64: 64, 256>}, {pipeline_mode = #tpu.pipeline_mode<synchronous>, transform_indices = @transform_2, window_bounds = array<i64: 1, 256>}, {pipeline_mode = #tpu.pipeline_mode<synchronous>, transform_indices = @transform_3, window_bounds = array<i64: 256, 6>}, {pipeline_mode = #tpu.pipeline_mode<synchronous>, transform_indices = @transform_4, window_bounds = array<i64: 1, 6>}, {pipeline_mode = #tpu.pipeline_mode<synchronous>, transform_indices = @transform_5, window_bounds = array<i64: 2, 6>}]} {
    %c0_i32 = arith.constant 0 : i32
    %0 = arith.cmpi eq, %arg0, %c0_i32 : i32
    %1 = arith.extui %0 : i1 to i32
    %c0_i32_0 = arith.constant 0 : i32
    %2 = arith.cmpi ne, %1, %c0_i32_0 : i32
    scf.if %2 {
      %cst = arith.constant 0.000000e+00 : f32
      %12 = vector.broadcast %cst : f32 to vector<2x1x64xf32>
      %c0 = arith.constant 0 : index
      %c0_6 = arith.constant 0 : index
      %c0_7 = arith.constant 0 : index
      %13 = vector.load %arg7[%c0, %c0_6, %c0_7] : memref<2x1x64xf32, #tpu.memory_space<vmem>>, vector<2x1x64xf32>
      tpu.vector_store %arg7[%c0, %c0_6, %c0_7], %12 {strides = array<i32>} : memref<2x1x64xf32, #tpu.memory_space<vmem>>, vector<2x1x64xf32>,
    } else {
    }
    %c2_i32 = arith.constant 2 : i32
    %3 = arith.cmpi slt, %arg0, %c2_i32 : i32
    %4 = arith.extui %3 : i1 to i32
    %c0_i32_1 = arith.constant 0 : i32
    %5 = arith.cmpi ne, %4, %c0_i32_1 : i32
    scf.if %5 {
      %c0 = arith.constant 0 : index
      %c0_6 = arith.constant 0 : index
      %c0_7 = arith.constant 0 : index
      %12 = vector.load %arg1[%c0, %c0_6, %c0_7] : memref<2x16x64xbf16, #tpu.memory_space<vmem>>, vector<2x16x64xbf16>
      %cst = arith.constant 1.000000e+00 : bf16
      %13 = vector.broadcast %cst : bf16 to vector<2x1x16xbf16>
      %c0_8 = arith.constant 0 : index
      %c0_9 = arith.constant 0 : index
      %c0_10 = arith.constant 0 : index
      %14 = vector.load %arg7[%c0_8, %c0_9, %c0_10] : memref<2x1x64xf32, #tpu.memory_space<vmem>>, vector<2x1x64xf32>
      "tpu.trace_start"() <{level = 10 : i32, message = "bqt,btd->bqd"}> : () -> ()
      %cst_11 = arith.constant dense<0.000000e+00> : vector<2x1x64xf32>
      %15 = tpu.matmul %13, %12, %cst_11 {dimension_numbers = #tpu.dot_dimension_numbers<[2], [1], [1], [2], [0, 0, 0, 1, 1, 2], [0], [0]>} : vector<2x1x16xbf16>, vector<2x16x64xbf16>, vector<2x1x64xf32> -> vector<2x1x64xf32>
      "tpu.trace_stop"() : () -> ()
      %16 = arith.addf %14, %15 : vector<2x1x64xf32>
      %c0_12 = arith.constant 0 : index
      %c0_13 = arith.constant 0 : index
      %c0_14 = arith.constant 0 : index
      %17 = vector.load %arg7[%c0_12, %c0_13, %c0_14] : memref<2x1x64xf32, #tpu.memory_space<vmem>>, vector<2x1x64xf32>
      tpu.vector_store %arg7[%c0_12, %c0_13, %c0_14], %16 {strides = array<i32>} : memref<2x1x64xf32, #tpu.memory_space<vmem>>, vector<2x1x64xf32>,
    } else {
    }
    %c2_i32_2 = arith.constant 2 : i32
    %6 = arith.cmpi eq, %arg0, %c2_i32_2 : i32
    %7 = arith.extui %6 : i1 to i32
    %c0_i32_3 = arith.constant 0 : i32
    %8 = arith.cmpi ne, %7, %c0_i32_3 : i32
    scf.if %8 {
      %12 = tpu.iota {dimensions = array<i32: 1>} : vector<1x16x1xi32>
      %c8_i32 = arith.constant 8 : i32
      %13 = vector.broadcast %c8_i32 : i32 to vector<1x16x1xi32>
      %14 = arith.cmpi slt, %12, %13 : vector<1x16x1xi32>
      %c0 = arith.constant 0 : index
      %c0_6 = arith.constant 0 : index
      %c0_7 = arith.constant 0 : index
      %15 = vector.load %arg1[%c0, %c0_6, %c0_7] : memref<2x16x64xbf16, #tpu.memory_space<vmem>>, vector<2x16x64xbf16>
      %cst = arith.constant 0.000000e+00 : f32
      %16 = arith.truncf %cst : f32 to bf16
      %17 = vector.shape_cast %14 : vector<1x16x1xi1> to vector<1x16x1xi1>
      %18 = vector.broadcast %17 : vector<1x16x1xi1> to vector<2x16x64xi1>
      %19 = vector.broadcast %16 : bf16 to vector<2x16x64xbf16>
      %20 = arith.select %18, %15, %19 : vector<2x16x64xi1>, vector<2x16x64xbf16>
      %cst_8 = arith.constant 1.000000e+00 : bf16
      %21 = vector.broadcast %cst_8 : bf16 to vector<2x1x16xbf16>
      %c0_9 = arith.constant 0 : index
      %c0_10 = arith.constant 0 : index
      %c0_11 = arith.constant 0 : index
      %22 = vector.load %arg7[%c0_9, %c0_10, %c0_11] : memref<2x1x64xf32, #tpu.memory_space<vmem>>, vector<2x1x64xf32>
      "tpu.trace_start"() <{level = 10 : i32, message = "bqt,btd->bqd"}> : () -> ()
      %cst_12 = arith.constant dense<0.000000e+00> : vector<2x1x64xf32>
      %23 = tpu.matmul %21, %20, %cst_12 {dimension_numbers = #tpu.dot_dimension_numbers<[2], [1], [1], [2], [0, 0, 0, 1, 1, 2], [0], [0]>} : vector<2x1x16xbf16>, vector<2x16x64xbf16>, vector<2x1x64xf32> -> vector<2x1x64xf32>
      "tpu.trace_stop"() : () -> ()
      %24 = arith.addf %22, %23 : vector<2x1x64xf32>
      %c0_13 = arith.constant 0 : index
      %c0_14 = arith.constant 0 : index
      %c0_15 = arith.constant 0 : index
      %25 = vector.load %arg7[%c0_13, %c0_14, %c0_15] : memref<2x1x64xf32, #tpu.memory_space<vmem>>, vector<2x1x64xf32>
      tpu.vector_store %arg7[%c0_13, %c0_14, %c0_15], %24 {strides = array<i32>} : memref<2x1x64xf32, #tpu.memory_space<vmem>>, vector<2x1x64xf32>,
    } else {
    }
    %c2_i32_4 = arith.constant 2 : i32
    %9 = arith.cmpi eq, %arg0, %c2_i32_4 : i32
    %10 = arith.extui %9 : i1 to i32
    %c0_i32_5 = arith.constant 0 : i32
    %11 = arith.cmpi ne, %10, %c0_i32_5 : i32
    scf.if %11 {
      %c0 = arith.constant 0 : index
      %c0_6 = arith.constant 0 : index
      %c0_7 = arith.constant 0 : index
      %12 = vector.load %arg7[%c0, %c0_6, %c0_7] : memref<2x1x64xf32, #tpu.memory_space<vmem>>, vector<2x1x64xf32>
      %13 = vector.shape_cast %12 : vector<2x1x64xf32> to vector<2x64xf32>
      %cst = arith.constant 2.500000e-02 : f32
      %14 = vector.broadcast %cst : f32 to vector<2x64xf32>
      %15 = arith.mulf %13, %14 : vector<2x64xf32>
      %c0_8 = arith.constant 0 : index
      %c0_9 = arith.constant 0 : index
      %16 = vector.load %arg2[%c0_8, %c0_9] : memref<64x256xf32, #tpu.memory_space<vmem>>, vector<64x256xf32>
      %cst_10 = arith.constant dense<0.000000e+00> : vector<2x256xf32>
      %17 = tpu.matmul %15, %16, %cst_10 {dimension_numbers = #tpu.dot_dimension_numbers<[1], [0], [0], [1], [0, 0, 1, 1], [], []>} : vector<2x64xf32>, vector<64x256xf32>, vector<2x256xf32> -> vector<2x256xf32>
      %c0_11 = arith.constant 0 : index
      %c0_12 = arith.constant 0 : index
      %18 = vector.load %arg3[%c0_11, %c0_12] : memref<1x256xf32, #tpu.memory_space<vmem>>, vector<1x256xf32>
      %19 = vector.broadcast %18 : vector<1x256xf32> to vector<2x256xf32>
      %20 = arith.addf %17, %19 : vector<2x256xf32>
      %cst_13 = arith.constant 0.000000e+00 : f32
      %21 = vector.broadcast %cst_13 : f32 to vector<2x256xf32>
      %22 = arith.maximumf %20, %21 : vector<2x256xf32>
      %c0_14 = arith.constant 0 : index
      %c0_15 = arith.constant 0 : index
      %23 = vector.load %arg4[%c0_14, %c0_15] : memref<256x6xf32, #tpu.memory_space<vmem>>, vector<256x6xf32>
      %cst_16 = arith.constant dense<0.000000e+00> : vector<2x6xf32>
      %24 = tpu.matmul %22, %23, %cst_16 {dimension_numbers = #tpu.dot_dimension_numbers<[1], [0], [0], [1], [0, 0, 1, 1], [], []>} : vector<2x256xf32>, vector<256x6xf32>, vector<2x6xf32> -> vector<2x6xf32>
      %c0_17 = arith.constant 0 : index
      %c0_18 = arith.constant 0 : index
      %25 = vector.load %arg5[%c0_17, %c0_18] : memref<1x6xf32, #tpu.memory_space<vmem>>, vector<1x6xf32>
      %26 = vector.broadcast %25 : vector<1x6xf32> to vector<2x6xf32>
      %27 = arith.addf %24, %26 : vector<2x6xf32>
      %c0_19 = arith.constant 0 : index
      %c0_20 = arith.constant 0 : index
      %28 = vector.load %arg6[%c0_19, %c0_20] : memref<2x6xf32, #tpu.memory_space<vmem>>, vector<2x6xf32>
      tpu.vector_store %arg6[%c0_19, %c0_20], %27 {strides = array<i32>} : memref<2x6xf32, #tpu.memory_space<vmem>>, vector<2x6xf32>,
    } else {
    }
    return
  }
  func.func @transform_0(%arg0: i32) -> (i32, i32, i32) {
    %c0_i32 = arith.constant 0 : i32
    %c0_i32_0 = arith.constant 0 : i32
    %c0_i32_1 = arith.constant 0 : i32
    return %c0_i32, %arg0, %c0_i32_0 : i32, i32, i32
  }
  func.func @transform_1(%arg0: i32) -> (i32, i32) {
    %c0_i32 = arith.constant 0 : i32
    %c0_i32_0 = arith.constant 0 : i32
    %c0_i32_1 = arith.constant 0 : i32
    return %c0_i32, %c0_i32_0 : i32, i32
  }
  func.func @transform_2(%arg0: i32) -> (i32, i32) {
    %c0_i32 = arith.constant 0 : i32
    %c0_i32_0 = arith.constant 0 : i32
    %c0_i32_1 = arith.constant 0 : i32
    return %c0_i32, %c0_i32_0 : i32, i32
  }
  func.func @transform_3(%arg0: i32) -> (i32, i32) {
    %c0_i32 = arith.constant 0 : i32
    %c0_i32_0 = arith.constant 0 : i32
    %c0_i32_1 = arith.constant 0 : i32
    return %c0_i32, %c0_i32_0 : i32, i32
  }
  func.func @transform_4(%arg0: i32) -> (i32, i32) {
    %c0_i32 = arith.constant 0 : i32
    %c0_i32_0 = arith.constant 0 : i32
    %c0_i32_1 = arith.constant 0 : i32
    return %c0_i32, %c0_i32_0 : i32, i32
  }
  func.func @transform_5(%arg0: i32) -> (i32, i32) {
    %c0_i32 = arith.constant 0 : i32
    %c0_i32_0 = arith.constant 0 : i32
    %c0_i32_1 = arith.constant 0 : i32
    return %c0_i32, %c0_i32_0 : i32, i32
  }
}

</mosaic_0001>

<bundles_post_ra>
// kernel: tpu_custom_call.1
= control target key start
LH: loop header
LB: loop body
LE: loop exit
PB: predicated region body
PF: predicated region fallthrough
CT: control target
= control target key end

     0   :  { %10 = vsyncpa [#allocation5], 0  ;;  %s1393_s18 = smov 0   ;;  %s1395_s19 = smov 0   ;;  %s1672_s0 = inlined_call_operand.vmem [shape: bf16[2,40,64], index: 0, kind: input, shape index: {}]   ;;  %s1673_s1 = inlined_call_operand.vmem [shape: f32[64,256], index: 1, kind: input, shape index: {}]   ;;  %s1674_s2 = inlined_call_operand.vmem [shape: f32[1,256], index: 2, kind: input, shape index: {}]   ;;  %s1675_s3 = inlined_call_operand.vmem [shape: f32[256,6], index: 3, kind: input, shape index: {}]   ;;  %s1676_s4 = inlined_call_operand.vmem [shape: f32[1,6], index: 4, kind: input, shape index: {}]   ;;  %s1677_s5 = inlined_call_operand.hbm [shape: f32[2,6], index: 5, kind: output, shape index: {}]  }
   0x1   :  { %s1397_s20 = smov 0  }
   0x2 LB: > { %s1409_s21 = sadd.s32 4294967295, %s1319_s20   ;;  %s1412_s22 = sadd.s32 1, %s1319_s20   ;;  %s1319_s20 = sphi %s1397_s20, %s1683_s20   ;;  %s1315_s19 = sphi %s1395_s19, %s1682_s19   ;;  %s1311_s18 = sphi %s1393_s18, %s1681_s18  }
   0x3   : > { %s20_s23 = ssub.s32 %s1319_s20, %s1412_s22  ;;  %s23_s24 = sadd.s32 1, %s1315_s19 }
   0x4   : > { %p21_p0 = scmp.eq.s32.totalorder %s20_s23, 0  ;;  %p30_p1 = scmp.ne.s32.totalorder %s1315_s19, %s1311_s18 }
   0x5   : > { %p31_p2 = scmp.eq.s32.totalorder %s1319_s20, 0  ;;  %p976_p4 = scmp.ge.s32.totalorder %s1319_s20, 3 }
   0x6   : > { %s1421_s25 = scalar_select %p21_p0, %s1315_s19, %s23_s24  }
   0x7   : > { %p32_p3 = por %p31_p2, %p30_p1  ;;  %173 = sbr.rel (%p976_p4) target bundleno = 74 (0x4a), region = 32 }
   0xe   : > { %176 = sbr.rel (!%p32_p3) target bundleno = 74 (0x4a), region = 36  ;;  %s178_s26 = sand.u32 (%p32_p3), 1, %s1315_s19  }
   0xf   : > { %s978_s27 = sshll.u32 (%p32_p3), %s1319_s20, 1  ;;  %s977_s28 = sshll.u32 (%p32_p3), %s178_s26, 4 }
  0x10   : > { %s182_s29 = ssub.s32 (%p32_p3), 5, %s978_s27  ;;  %s1011_s30 = sshll.u32 (%p32_p3), %s1319_s20, 3 }
  0x11   : > { %p183_p5 = scmp.lt.s32.totalorder (%p32_p3), %s182_s29, 2  ;;  %s1432_s8 = scalar_lea.vmem (%p32_p3), %s1672_s0, %s1011_s30  }
  0x12   : > { %s1435_s10 = scalar_lea.vmem (%p32_p3), [#allocation3], %s977_s28  }
  0x15   : > { %s1685_s29 = smov (!%p183_p5, %s182_s29), 2 }
  0x16   : > { %s979_s9 = sshll.u32 %s1685_s29, 7 }
  0x17   : > { %p982_p6 = scmp.eq.s32.totalorder %s979_s9, 0 }
  0x18   : > { %s1438_s11 = sshrl.u32 (!%p982_p6), %s1685_s29, 1 }
  0x19   : > { %191 = sbr.rel (%p982_p6) target bundleno = 74 (0x4a), region = 40  ;;  %p983_p7 = scmp.le.s32.totalorder (!%p982_p6), %s1438_s11, 0 }
  0x20   : > { %934 = sbr.rel (%p983_p7) target bundleno = 53 (0x35), region = 154  ;;  %s1678_s12 = smov (!%p983_p7), %s1435_s10 }
  0x21   : > { %s1679_s13 = smov (!%p983_p7), %s1432_s8  ;;  %s1447_s14 = smov (!%p983_p7), 0  }
  0x22   : > { %s1333_s15 = smov (!%p983_p7), 0  }
  0x27 LB: >> { %v207_v0 = vld [vmem:[%s1327_s13] sm:$0xf]  ;;  %v209_v1 = vld [vmem:[%s1327_s13 + $0x4] sm:$0xf]  ;;  %v211_v2 = vld [vmem:[%s1327_s13 + $0x14] sm:$0xf]  ;;  %s1335_s15 = sphi %s1333_s15, %s201_s15   ;;  %s1331_s14 = sphi %s1447_s14, %s1680_s14   ;;  %s1327_s13 = sphi %s1679_s13, %s220_s13   ;;  %s1323_s12 = sphi %s1678_s12, %s221_s12  }
  0x28   : >> { %208 = vst [vmem:[%s1323_s12] sm:$0xf] %v207_v0  ;;  %210 = vst [vmem:[%s1323_s12 + $0x4] sm:$0xf] %v209_v1  ;;  %v213_v3 = vld [vmem:[%s1327_s13 + $0x18] sm:$0xf]  ;;  %s215_s16 = sadd.s32 1, %s1331_s14 }
  0x29   : >> { %212 = vst [vmem:[%s1323_s12 + $0x8] sm:$0xf] %v211_v2  ;;  %214 = vst [vmem:[%s1323_s12 + $0xc] sm:$0xf] %v213_v3  ;;  %p216_p8 = scmp.ge.s32.totalorder %s215_s16, %s1438_s11  ;;  %s201_s15 = sadd.s32 1, %s1335_s15  }
  0x2a   : >> { %p200_p9 = scmp.ge.s32.totalorder %s201_s15, %s1438_s11 }
  0x2b   : >> { %s1687_s16 = smov (%p216_p8, %s215_s16), 0 }
  0x2c   : >> { %s984_s17 = sshll.u32 %s1687_s16, 3  ;;  %s1680_s14 = smov %s1687_s16 }
  0x2d   : >> { %s220_s13 = scalar_lea.vmem %s1432_s8, %s984_s17   ;;  %s221_s12 = scalar_lea.vmem %s1435_s10, %s984_s17 [#allocation3]  }
  0x2e   : > { %203 = sbr.rel (!%p200_p9) target bundleno = 39 (0x27), region = 160 }
  0x35 PF: > { %s1463_s23 = sand.u32 1, %s1685_s29   ;;  %s1012_s24 = sshll.u32 %s1438_s11, 3 }
  0x36   : > { %s1467_s26 = scalar_lea.vmem %s1432_s8, %s1012_s24   ;;  %s228_s27 = scalar_lea.vmem %s1435_s10, %s1012_s24 [#allocation3]  }
  0x37   : > { %p989_p10 = scmp.le.s32.totalorder %s1463_s23, 0 }
  0x38   : > { %s1337_s28 = smov (!%p989_p10), %s228_s27   ;;  %s1341_s30 = smov (!%p989_p10), %s1467_s26  }
  0x39   : > { %948 = sbr.rel (%p989_p10) target bundleno = 74 (0x4a), region = 165  ;;  %s1345_s6 = smov (!%p989_p10), 0  }
  0x3a   : > { %s1349_s7 = smov (!%p989_p10), 0  }
  0x40 LB: >> { %v238_v4 = vld [vmem:[%s1343_s30] sm:$0xf]  ;;  %v240_v5 = vld [vmem:[%s1343_s30 + $0x14] sm:$0xf]  ;;  %s242_s29 = sadd.s32 1, %s1347_s6  ;;  %s232_s7 = sadd.s32 1, %s1351_s7   ;;  %s1351_s7 = sphi %s1349_s7, %s232_s7   ;;  %s1347_s6 = sphi %s1345_s6, %s1346_s6   ;;  %s1343_s30 = sphi %s1341_s30, %s247_s30   ;;  %s1339_s28 = sphi %s1337_s28, %s248_s28  }
  0x41   : >> { %239 = vst [vmem:[%s1339_s28] sm:$0xf] %v238_v4  ;;  %241 = vst [vmem:[%s1339_s28 + $0x8] sm:$0xf] %v240_v5  ;;  %p243_p11 = scmp.ge.s32.totalorder %s242_s29, %s1463_s23  ;;  %p231_p12 = scmp.ge.s32.totalorder %s232_s7, %s1463_s23 }
  0x43   : >> { %s1689_s29 = smov (%p243_p11, %s242_s29), 0  ;;  %234 = sbr.rel (!%p231_p12) target bundleno = 64 (0x40), region = 171 }
  0x44   : >> { %s990_s8 = sshll.u32 %s1689_s29, 2  ;;  %s1346_s6 = smov %s1689_s29  }
  0x45   : >> { %s247_s30 = scalar_lea.vmem %s1467_s26, %s990_s8   ;;  %s248_s28 = scalar_lea.vmem %s228_s27, %s990_s8 [#allocation3]  }
  0x4a PF: > { %p992_p13 = scmp.ge.s32.totalorder %s1319_s20, 1  ;;  %p346_p0 = scmp.lt.s32.totalorder %s1319_s20, 4 }
  0x4c   : > { %p347_p1 = pnand %p992_p13, %p346_p0 }
  0x4d   : > { %s353_s9 = sand.u32 (!%p347_p1), 1, %s1311_s18   ;;  %p994_p2 = scmp.ne.s32.totalorder (!%p347_p1), %s1409_s21, 0 }
  0x4e   : > { %350 = sbr.rel (%p347_p1) target bundleno = 1023 (0x3ff), region = 98  ;;  %s993_s10 = sshll.u32 (!%p347_p1), %s353_s9, 4 }
  0x4f   : > { %s1478_s11 = scalar_lea.vmem (!%p347_p1), [#allocation3], %s993_s10 }
  0x55   : > { %385 = sbr.rel (%p994_p2) target bundleno = 92 (0x5c), region = 106  ;;  %vm386_vm0 = vcmask (!%p994_p2), 516096   ;;  %v1353_v6 = vmov (!%p994_p2), 0.0  }
  0x56   : > { %387 = vst.msk [vmem:[#allocation2] sm:$0x1] (!%p994_p2), %vm386_vm0, %v1353_v6  ;;  %388 = vst.msk [vmem:[#allocation2 + $0x1] sm:$0x1] (!%p994_p2), %vm386_vm0, %v1353_v6 }
  0x5c PF: > { %p995_p3 = scmp.ge.s32.totalorder %s1409_s21, 2 }
  0x5d   : > { %v1233_v7 = vld [vmem:[%s1478_s11] sm:$0xff] (!%p995_p3)   ;;  %v1354_v8 = vmov (!%p995_p3), 0.0   ;;  %v1234_v9 = vld [vmem:[%s1478_s11 + $0x8] sm:$0xff] (!%p995_p3)   ;;  %vm1355_vm1 = vmmov (!%p995_p3), 0   ;;  %vm405_vm2 = vcmask (!%p995_p3), 130048   ;;  %vm497_vm3 = vcmask (!%p995_p3), 516096  }
  0x5e   : > { %392 = sbr.rel (%p995_p3) target bundleno = 314 (0x13a), region = 110  ;;  %1057 = vmatprep.subr.bf16.mxu0 (!%p995_p3), %v1354_v8  ;;  %1063 = vmatprep.subr.bf16.mxu1 (!%p995_p3), %v1354_v8  ;;  %v1356_v10 = vmov (!%p995_p3), 1065369472   ;;  %v397_v11 = vld [vmem:[#allocation2] sm:$0x1] (!%p995_p3) }
  0x5f   : > { %1058 = vmatpush3.bf16.msra.mxu0 (!%p995_p3), %v1233_v7  ;;  %1059 = vmatprep.mubr.msk.bf16.mxu0 (!%p995_p3), %vm1355_vm1, %v1354_v8  ;;  %v398_v12 = vld [vmem:[#allocation2 + $0x1] sm:$0x1] (!%p995_p3) }
  0x60   : > { %1064 = vmatpush3.bf16.msra.mxu1 (!%p995_p3), %v1234_v9  ;;  %1065 = vmatprep.mubr.msk.bf16.mxu1 (!%p995_p3), %vm1355_vm1, %v1354_v8 }
  0x62   : > { %1060 = vmatmul.mubr.msk.bf16.vlgmr.msra.gmra.mrb[0].mxu0 (!%p995_p3), %vm405_vm2, %v1356_v10 }
  0x63   : > { %1066 = vmatmul.mubr.msk.bf16.vlgmr.msra.gmra.mrb[0].mxu1 (!%p995_p3), %vm405_vm2, %v1356_v10 }
 0x135   : > { %v443_v13 = vpop.f32.mrb[0].mxu0 }
 0x136   : > { %v495_v14 = vadd.f32 %v443_v13, %v397_v11  ;;  %v489_v15 = vpop.f32.mrb[0].mxu1  ;;  %v1061_v16 = vpop.f32.mrb[1].mxu0 }
 0x137   : > { %v496_v17 = vadd.f32 %v489_v15, %v398_v12  ;;  %v1067_v18 = vpop.f32.mrb[1].mxu1  ;;  %v446_v19 = vpop.f32.mrb[2].mxu0 }
 0x138   : > { %498 = vst.msk [vmem:[#allocation2] sm:$0x1] %vm497_vm3, %v495_v14  ;;  %v492_v20 = vpop.f32.mrb[2].mxu1  ;;  %v1062_v21 = vpop.f32.mrb[3].mxu0 }
 0x139   : > { %499 = vst.msk [vmem:[#allocation2 + $0x1] sm:$0x1] %vm497_vm3, %v496_v17  ;;  %v1068_v22 = vpop.f32.mrb[3].mxu1 }
 0x13a PF: > { %p1000_p4 = scmp.ne.s32.totalorder %s1409_s21, 2 }
 0x13b   : > { %v509_v23 = vld [vmem:[%s1478_s11] sm:$0xf] (!%p1000_p4)  ;;  %v510_v24 = vld [vmem:[%s1478_s11 + $0x4] sm:$0xf] (!%p1000_p4)  ;;  %v1357_v25 = vmov (!%p1000_p4), 0.0   ;;  %vm1358_vm4 = vmmov (!%p1000_p4), 1  }
 0x13c   : > { %503 = sbr.rel (%p1000_p4) target bundleno = 998 (0x3e6), region = 114  ;;  %1069 = vmatprep.subr.bf16.mxu0 (!%p1000_p4), %v1357_v25  ;;  %v511_v26 = vld [vmem:[%s1478_s11 + $0x8] sm:$0xf] (!%p1000_p4)  ;;  %v512_v27 = vld [vmem:[%s1478_s11 + $0xc] sm:$0xf] (!%p1000_p4)  ;;  %vm517_vm5 = vmpackc.low (!%p1000_p4), %vm1358_vm4, %vm1358_vm4  ;;  %vm1359_vm6 = vmmov (!%p1000_p4), 0  }
 0x13d   : > { %vm518_vm7 = vmpackc.low (!%p1000_p4), %vm1359_vm6, %vm1359_vm6  ;;  %v519_v28 = vsel (!%p1000_p4), %vm517_vm5, %v509_v23, 0  ;;  %1071 = vmatprep.mubr.msk.bf16.mxu0 (!%p1000_p4), %vm1359_vm6, %v1357_v25  ;;  %v521_v30 = vsel (!%p1000_p4), %vm517_vm5, %v511_v26, 0  ;;  %vm531_vm8 = vcmask (!%p1000_p4), 130048   ;;  %v1360_v34 = vmov (!%p1000_p4), 1065369472   ;;  %v631_v35 = vld [vmem:[%s1673_s1 + $0x8] sm:$0xff] (!%p1000_p4) }
 0x13e   : > { %v520_v29 = vsel (!%p1000_p4), %vm518_vm7, %v510_v24, 0  ;;  %v522_v31 = vsel (!%p1000_p4), %vm518_vm7, %v512_v27, 0  ;;  %v633_v36 = vld [vmem:[%s1673_s1 + $0x18] sm:$0xff] (!%p1000_p4)  ;;  %v630_v38 = vld [vmem:[%s1673_s1] sm:$0xff] (!%p1000_p4)  ;;  %v632_v39 = vld [vmem:[%s1673_s1 + $0x10] sm:$0xff] (!%p1000_p4)  ;;  %vm623_vm9 = vcmask (!%p1000_p4), 516096  }
 0x13f   : > { %v1001_v32 = vcombine.low (!%p1000_p4), %v519_v28, %v520_v29  ;;  %v1003_v33 = vcombine.low (!%p1000_p4), %v521_v30, %v522_v31  ;;  %v1081_v37 = vpack.c.bf16 (!%p1000_p4), %v633_v36, %v631_v35  ;;  %v1083_v40 = vpack.c.bf16 (!%p1000_p4), %v632_v39, %v630_v38  ;;  %v635_v41 = vld [vmem:[%s1673_s1 + $0x28] sm:$0xff] (!%p1000_p4)  ;;  %v637_v42 = vld [vmem:[%s1673_s1 + $0x38] sm:$0xff] (!%p1000_p4)  ;;  %v634_v43 = vld [vmem:[%s1673_s1 + $0x20] sm:$0xff] (!%p1000_p4) }
 0x140   : > { %v1085_v44 = vpack.c.bf16 (!%p1000_p4), %v637_v42, %v635_v41  ;;  %v636_v45 = vld [vmem:[%s1673_s1 + $0x30] sm:$0xff] (!%p1000_p4)  ;;  %v639_v46 = vld [vmem:[%s1673_s1 + $0x48] sm:$0xff] (!%p1000_p4)  ;;  %v641_v47 = vld [vmem:[%s1673_s1 + $0x58] sm:$0xff] (!%p1000_p4)  ;;  %vm675_vm10 = vcmask (!%p1000_p4), 523264   ;;  %vm860_vm11 = vcmask (!%p1000_p4), 41984  }
 0x141   : > { %1070 = vmatpush3.bf16.msra.mxu0 (!%p1000_p4), %v1001_v32  ;;  %v1087_v48 = vpack.c.bf16 (!%p1000_p4), %v636_v45, %v634_v43  ;;  %v1089_v49 = vpack.c.bf16 (!%p1000_p4), %v641_v47, %v639_v46  ;;  %v638_v50 = vld [vmem:[%s1673_s1 + $0x40] sm:$0xff] (!%p1000_p4)  ;;  %v640_v51 = vld [vmem:[%s1673_s1 + $0x50] sm:$0xff] (!%p1000_p4)  ;;  %v643_v52 = vld [vmem:[%s1673_s1 + $0x68] sm:$0xff] (!%p1000_p4)  ;;  %v648_v46 = vlaneseq (!%p1000_p4)  ;;  %v1361_v47 = vmov (!%p1000_p4), 1966171168  }
 0x142   : > { %1075 = vmatprep.subr.bf16.mxu0 (!%p1000_p4), %v1357_v25  ;;  %v645_v53 = vld [vmem:[%s1673_s1 + $0x78] sm:$0xff] (!%p1000_p4)  ;;  %v1091_v54 = vpack.c.bf16 (!%p1000_p4), %v640_v51, %v638_v50  ;;  %v642_v56 = vld [vmem:[%s1673_s1 + $0x60] sm:$0xff] (!%p1000_p4)  ;;  %v644_v57 = vld [vmem:[%s1673_s1 + $0x70] sm:$0xff] (!%p1000_p4) }
 0x143   : > { %v1093_v55 = vpack.c.bf16 %v645_v53, %v643_v52  ;;  %v1095_v58 = vpack.c.bf16 %v644_v57, %v642_v56  ;;  %v767_v59 = vld [vmem:[%s1675_s3 + $0x80] sm:$0xff]  ;;  %v768_v60 = vld [vmem:[%s1675_s3 + $0x88] sm:$0xff]  ;;  %v769_v0 = vld [vmem:[%s1675_s3 + $0x90] sm:$0xff] }
 0x144   : > { %1072 = vmatmul.mubr.msk.bf16.vlgmr.msra.gmra.mrb[0].mxu0 %vm531_vm8, %v1360_v34  ;;  %v751_v61 = vld [vmem:[%s1675_s3] sm:$0xff]  ;;  %v1097_v62 = vpack.c.bf16 %v768_v60, %v767_v59  ;;  %v752_v63 = vld [vmem:[%s1675_s3 + $0x8] sm:$0xff]  ;;  %v770_v1 = vld [vmem:[%s1675_s3 + $0x98] sm:$0xff] }
 0x145   : > { %1076 = vmatpush3.bf16.msra.mxu0 %v1003_v33  ;;  %1077 = vmatprep.mubr.msk.bf16.mxu0 %vm1359_vm6, %v1357_v25  ;;  %v1099_v2 = vpack.c.bf16 %v752_v63, %v751_v61  ;;  %v1101_v3 = vpack.c.bf16 %v770_v1, %v769_v0  ;;  %v753_v4 = vld [vmem:[%s1675_s3 + $0x10] sm:$0xff]  ;;  %v754_v5 = vld [vmem:[%s1675_s3 + $0x18] sm:$0xff]  ;;  %v771_v6 = vld [vmem:[%s1675_s3 + $0xa0] sm:$0xff] }
 0x146   : > { %1082 = vmatprep.subr.bf16.mxu0 %v1081_v37  ;;  %1098 = vmatprep.subr.bf16.mxu1 %v1097_v62  ;;  %v772_v7 = vld [vmem:[%s1675_s3 + $0xa8] sm:$0xff]  ;;  %v1103_v8 = vpack.c.bf16 %v754_v5, %v753_v4  ;;  %v755_v10 = vld [vmem:[%s1675_s3 + $0x20] sm:$0xff]  ;;  %v773_v12 = vld [vmem:[%s1675_s3 + $0xb0] sm:$0xff] }
 0x147   : > { %1100 = vmatpush3.bf16.msra.mxu1 %v1099_v2  ;;  %v1105_v9 = vpack.c.bf16 %v772_v7, %v771_v6  ;;  %v756_v11 = vld [vmem:[%s1675_s3 + $0x28] sm:$0xff]  ;;  %v774_v13 = vld [vmem:[%s1675_s3 + $0xb8] sm:$0xff]  ;;  %v757_v16 = vld [vmem:[%s1675_s3 + $0x30] sm:$0xff] }
 0x148   : > { %1102 = vmatprep.subr.bf16.mxu1 %v1101_v3  ;;  %v1107_v14 = vpack.c.bf16 %v756_v11, %v755_v10  ;;  %v1109_v15 = vpack.c.bf16 %v774_v13, %v773_v12  ;;  %v758_v17 = vld [vmem:[%s1675_s3 + $0x38] sm:$0xff]  ;;  %v775_v18 = vld [vmem:[%s1675_s3 + $0xc0] sm:$0xff]  ;;  %v776_v19 = vld [vmem:[%s1675_s3 + $0xc8] sm:$0xff] }
 0x149   : > { %v1111_v20 = vpack.c.bf16 %v758_v17, %v757_v16  ;;  %v1113_v21 = vpack.c.bf16 %v776_v19, %v775_v18  ;;  %v759_v22 = vld [vmem:[%s1675_s3 + $0x40] sm:$0xff]  ;;  %v760_v23 = vld [vmem:[%s1675_s3 + $0x48] sm:$0xff]  ;;  %v777_v24 = vld [vmem:[%s1675_s3 + $0xd0] sm:$0xff] }
 0x14a   : > { %v1115_v26 = vpack.c.bf16 %v760_v23, %v759_v22  ;;  %v761_v28 = vld [vmem:[%s1675_s3 + $0x50] sm:$0xff]  ;;  %v762_v29 = vld [vmem:[%s1675_s3 + $0x58] sm:$0xff]  ;;  %v779_v30 = vld [vmem:[%s1675_s3 + $0xe0] sm:$0xff] }
 0x14b   : > { %1104 = vmatpush3.bf16.msra.mxu1 %v1103_v8  ;;  %v780_v31 = vld [vmem:[%s1675_s3 + $0xe8] sm:$0xff]  ;;  %v1119_v32 = vpack.c.bf16 %v762_v29, %v761_v28  ;;  %v763_v59 = vld [vmem:[%s1675_s3 + $0x60] sm:$0xff]  ;;  %v781_v62 = vld [vmem:[%s1675_s3 + $0xf0] sm:$0xff] }
 0x14c   : > { %1078 = vmatmul.mubr.msk.bf16.vlgmr.msra.gmra.mrb[4].mxu0 %vm531_vm8, %v1360_v34  ;;  %1106 = vmatprep.subr.bf16.mxu1 %v1105_v9  ;;  %v1121_v33 = vpack.c.bf16 %v780_v31, %v779_v30  ;;  %v523_v34 = vld [vmem:[#allocation2] sm:$0x1]  ;;  %v764_v60 = vld [vmem:[%s1675_s3 + $0x68] sm:$0xff]  ;;  %v782_v63 = vld [vmem:[%s1675_s3 + $0xf8] sm:$0xff] }
 0x14d   : > { %742 = vmatprep.mubr.f32.mxu0 %v1357_v25  ;;  %1084 = vmatpush1.bf16.msra.mxu0 %v1083_v40  ;;  %v778_v25 = vld [vmem:[%s1675_s3 + $0xd8] sm:$0xff]  ;;  %v524_v40 = vld [vmem:[#allocation2 + $0x1] sm:$0x1]  ;;  %v1123_v61 = vpack.c.bf16 %v764_v60, %v763_v59  ;;  %v1125_v0 = vpack.c.bf16 %v782_v63, %v781_v62  ;;  %v765_v1 = vld [vmem:[%s1675_s3 + $0x70] sm:$0xff] }
 0x14e   : > { %1086 = vmatprep.subr.bf16.mxu0 %v1085_v44  ;;  %v1117_v27 = vpack.c.bf16 %v778_v25, %v777_v24  ;;  %v766_v2 = vld [vmem:[%s1675_s3 + $0x78] sm:$0xff]  ;;  %v646_v5 = vld [vmem:[%s1674_s2] sm:$0x3] }
 0x14f   : > { %1108 = vmatpush3.bf16.msra.mxu1 %v1107_v14  ;;  %v1127_v3 = vpack.c.bf16 %v766_v2, %v765_v1  ;;  %v1006_v16 = vld [vmem:[%s1676_s4] ss:$0 sm:$0xff] }
 0x150   : > { %1110 = vmatprep.subr.bf16.mxu1 %v1109_v15 }
 0x151   : > { %1088 = vmatpush1.bf16.msra.mxu0 %v1087_v48  ;;  %v662_v48 = vunpack.c.l.s4 %v1361_v47 }
 0x152   : > { %1090 = vmatprep.subr.bf16.mxu0 %v1089_v49  ;;  %v649_v49 = vshrl.u32 %v648_v46, 7 }
 0x153   : > { %1112 = vmatpush3.bf16.msra.mxu1 %v1111_v20  ;;  %v663_v50 = vunpack.c.0.s8 %v662_v48 }
 0x154   : > { %1114 = vmatprep.subr.bf16.mxu1 %v1113_v21  ;;  %v650_v4 = vsub.s32 0, %v649_v49  ;;  %v654_v6 = vsub.s32 1, %v649_v49 }
 0x155   : > { %1092 = vmatpush1.bf16.msra.mxu0 %v1091_v54 }
 0x156   : > { %1094 = vmatprep.subr.bf16.mxu0 %v1093_v55  ;;  %v666_v55 = vsub.s32 %v663_v50, %v649_v49  ;;  %v651_v7 = vrot.slane %v646_v5, %v650_v4  ;;  %v655_v8 = vrot.slane %v646_v5, %v654_v6 }
 0x157   : > { %1116 = vmatpush3.bf16.msra.mxu1 %v1115_v26 }
 0x158   : > { %1118 = vmatprep.subr.bf16.mxu1 %v1117_v27 }
 0x159   : > { %1096 = vmatpush1.bf16.msra.mxu0 %v1095_v58 }
 0x15b   : > { %1120 = vmatpush3.bf16.msra.mxu1 %v1119_v32 }
 0x15c   : > { %1122 = vmatprep.subr.bf16.mxu1 %v1121_v33 }
 0x15f   : > { %1124 = vmatpush3.bf16.msra.mxu1 %v1123_v61 }
 0x160   : > { %1126 = vmatprep.subr.bf16.mxu1 %v1125_v0 }
 0x163   : > { %1128 = vmatpush3.bf16.msra.mxu1 %v1127_v3 }
 0x217   : > { %v569_v35 = vpop.f32.mrb[0].mxu0 }
 0x218   : > { %v621_v36 = vadd.f32 %v569_v35, %v523_v34  ;;  %v1073_v37 = vpop.f32.mrb[1].mxu0 }
 0x219   : > { %v572_v38 = vpop.f32.mrb[2].mxu0 }
 0x21a   : > { %624 = vst.msk [vmem:[#allocation2] sm:$0x1] %vm623_vm9, %v621_v36  ;;  %v1074_v39 = vpop.f32.mrb[3].mxu0 }
 0x21f   : > { %v615_v41 = vpop.f32.mrb[4].mxu0 }
 0x220   : > { %v622_v42 = vadd.f32 %v615_v41, %v524_v40  ;;  %v1079_v43 = vpop.f32.mrb[5].mxu0 }
 0x221   : > { %v618_v44 = vpop.f32.mrb[6].mxu0  ;;  %v626_v51 = vld [vmem:[#allocation2] sm:$0x1] }
 0x222   : > { %625 = vst.msk [vmem:[#allocation2 + $0x1] sm:$0x1] %vm623_vm9, %v622_v42  ;;  %v1080_v45 = vpop.f32.mrb[7].mxu0  ;;  %v628_v53 = vmul.f32 0.025, %v626_v51 }
 0x229   : > { %v627_v52 = vld [vmem:[#allocation2 + $0x1] sm:$0x1] }
 0x22a   : > { %v629_v54 = vmul.f32 0.025, %v627_v52 }
 0x22c   : > { %v660_v56 = vcombine.low %v628_v53, %v629_v54 }
 0x22e   : > { %v667_v57 = vrot.slane %v660_v56, %v666_v55 }
 0x230   : > { %v674_v58 = vrot.slane %v667_v57, %v666_v55 }
 0x232   : > { %1005 = vmatmul.mubr.msk.f32.vlgmr.msra.gmra.mrb[8].mxu0 %vm675_vm10, %v674_v58 }
 0x305   : > { %v744_v9 = vpop.f32.mrb[8].mxu0 }
 0x306   : > { %v745_v10 = vadd.f32 %v744_v9, %v651_v7  ;;  %v746_v11 = vpop.f32.mrb[9].mxu0 }
 0x307   : > { %v747_v12 = vadd.f32 %v746_v11, %v655_v8 }
 0x308   : > { %v749_v14 = vmax.f32 %v745_v10, 0.0 }
 0x309   : > { %v750_v13 = vmax.f32 %v747_v12, 0.0 }
 0x30b   : > { %854 = vmatprep.mubr.f32.mxu1 %v750_v13 }
 0x30c   : > { %855 = vmatmul.mubr.f32.vlgmr.msra.gmra.mrb[0].mxu1 %v749_v14 }
 0x3df   : > { %v1054_v15 = vpop.f32.mrb[0].mxu1 }
 0x3e0   : > { %v1055_v17 = vpop.f32.mrb[1].mxu1 }
 0x3e1   : > { %v1056_v18 = vadd.f32 %v1055_v17, %v1054_v15 }
 0x3e3   : > { %v857_v19 = vadd.f32 %v1056_v18, %v1006_v16 }
 0x3e5   : > { %861 = vst.msk [vmem:[#allocation4] sm:$0x3] %vm860_vm11, %v857_v19 }
 0x3e6 PF: > { %p1133_p5 = scmp.eq.s32.totalorder %s1409_s21, 2  ;;  %s1362_s29 = smov [#allocation4]  }
 0x3e7   : > { %s869_s8 = sshll.u32 %s1362_s29, 4  ;;  %s870_s8 = int_to_ptr.vmem [resolvable:$true] %s869_s8 }
 0x3e8   : > { %s1235_s9 = scalar_lea.vmem %s870_s8, 32  ;;  %p1242_p9 = scmp.lt.s32.totalorder %s870_s8, %s870_s8 }
 0x3e9   : > { %p1236_p6 = scmp.ne.s32.totalorder %s870_s8, %s1235_s9  ;;  %p1243_p10 = scmp.lt.s32.totalorder %s1235_s9, %s1235_s9 }
 0x3eb   : > { %p1237_p7 = pnand %p1236_p6, %p1133_p5  ;;  %p1244_p11 = por %p1243_p10, %p1242_p9 }
 0x3ed   : > { %p1238_p8 = pneg %p1237_p7 }
 0x3ef   : > { %p1245_p12 = pnand %p1244_p11, %p1238_p8 }
 0x3f1   : > { %1248 = shalt.err (!%p1245_p12)
}
 0x3f2   : > { %s1249_s18 = scalar_lea.hbm %s1677_s5, 32 }
 0x3f3   : > { %p1250_p13 = scmp.ne.s32.totalorder %s1677_s5, %s1249_s18  ;;  %p1255_p2 = scmp.lt.u32.totalorder %s1249_s18, %s1677_s5 }
 0x3f5   : > { %p1251_p0 = pnand %p1250_p13, %p1133_p5 }
 0x3f7   : > { %p1252_p1 = pneg %p1251_p0 }
 0x3f9   : > { %p1257_p3 = pnand %p1255_p2, %p1252_p1 }
 0x3fb   : > { %1260 = shalt.err (!%p1257_p3)
}
 0x3fc   : > { %1130 = dma.vmem_to_hbm [thread:$0]  (%p1133_p5), %s870_s8, 32, %s1677_s5, [#allocation5]  }
 0x3fd   : > { %1306 = dma.done.wait (%p1133_p5), [#allocation5], 32  }
 0x3fe   : > { %1308 = vsyncadd (%p1133_p5), [#allocation5], 4294967264 }
 0x3ff PF: > { %p13_p4 = scmp.ge.s32.totalorder %s1412_s22, 5   ;;  %s1681_s18 = smov %s1315_s19 }
 0x400   : > { %s1682_s19 = smov %s1421_s25  ;;  %s1683_s20 = smov %s1412_s22 }
 0x401   :  { %15 = sbr.rel (!%p13_p4) target bundleno = 2 (0x2), region = 182 }
 0x408   :  { %882 = vsyncpa [#allocation5], 1 }
 0x409   :  { %884 = vsyncpa [#allocation5 + $0x1], 1 }

</bundles_post_ra>
